<compile_context>
chip_gen: v5e
topology: v5e:2x2
jax: 0.10.0
libtpu: 0.0.40
codegen_flags: <defaults>
</compile_context>

<pallas_src>
import math
from functools import partial

import numpy as np
import jax
import jax.numpy as jnp
from jax import lax
from jax.experimental import pallas as pl
from jax.experimental.pallas import tpu as pltpu

LANE = 128
SUBLANE = 8


def row_att_kernel(x_ref, wqkv_ref, bqkv_ref, wof_ref, bof_ref,
                   hmask_ref, sbias_ref, out_ref,
                   *, num_heads, head_dims):
    f32, bf16 = jnp.float32, jnp.bfloat16
    H, Dh = num_heads, head_dims
    E = H * Dh
    N = x_ref.shape[0]                      # rows (all sequences, padded)

    x = x_ref[...]                          # (N, d_pad) bf16 — lane-dense load

    # Fused QKV projection: Wqkv folds AttBlock's Q_w/K_w/V_w with the MHA
    # in-projections (fold done in f32 in the wrapper), so ONE matmul with a
    # 96-lane output replaces six small ones.
    qkv = jnp.dot(x, wqkv_ref[...], preferred_element_type=f32) + bqkv_ref[...]
    q = qkv[:, 0 * E:1 * E]                 # (N, E) f32
    k = qkv[:, 1 * E:2 * E].astype(bf16)
    v = qkv[:, 2 * E:3 * E].astype(bf16)

    # Head-stacked masked queries: row h*N + n is (head h, row n); zeroing the
    # other heads' lanes restricts the E-wide contraction to head h's slice,
    # so a single score matmul covers every head.  hmask is a precomputed
    # constant — no in-kernel iota/reshape work.
    # NOTE: this does H× the strictly necessary MXU work on the score and PV
    # matmuls; fine while the MXU has slack — switch to a (H, N, Dh) batched
    # dot_general if E / H / N grow substantially.
    hmask = hmask_ref[...]                  # (H*N, E) f32 in {0, 1}
    q_msk = (jnp.tile(q, (H, 1)) * hmask).astype(bf16)

    s = lax.dot_general(q_msk, k, (((1,), (1,)), ((), ())),
                        preferred_element_type=f32)        # (H*N, N)
    s = s * (1.0 / math.sqrt(Dh)) + sbias_ref[...]         # block-diag seq bias

    # Softmax in f32; normalization via approximate reciprocal on the EUP.
    s = s - jnp.max(s, axis=-1, keepdims=True)
    p = jnp.exp(s)
    p = p * pl.reciprocal(jnp.sum(p, axis=-1, keepdims=True), approx=True)

    # One PV matmul for all heads; keep only each head's own lanes, then fold
    # the H row-blocks back to (N, E) with static sublane slices (no reshape).
    pv = jnp.dot(p.astype(bf16), v, preferred_element_type=f32) * hmask
    attn = pv[0:N, :]
    for h in range(1, H):
        attn = attn + pv[h * N:(h + 1) * N, :]

    # Folded out-projection (MHA out_proj + final Linear) — 128-lane dense vst.
    y = jnp.dot(attn.astype(bf16), wof_ref[...], preferred_element_type=f32)
    out_ref[...] = (y + bof_ref[...]).astype(out_ref.dtype)


def prepare_params(params, d):
    """One-time parameter plumbing: fold, pad, cast.  Call once and reuse."""
    Qw, Kw, Vw, Wq, Wk, Wv, bq, bk, bv, Wo, bo, Wlin, blin = params
    f32, bf16 = jnp.float32, jnp.bfloat16
    E = Wq.shape[0]
    d_pad = pl.cdiv(d, LANE) * LANE
    pc = d_pad - d

    # Fold chained linear pairs in f32, then cast the folded weights to bf16.
    Wqkv = jnp.concatenate(
        [Qw.T @ Wq.T, Kw.T @ Wk.T, Vw.T @ Wv.T], axis=1)          # (d, 3E)
    bqkv = jnp.concatenate([bq, bk, bv]).reshape(1, 3 * E)         # (1, 3E)
    Wof = Wo.T @ Wlin.T                                            # (E, d)
    bof = (bo @ Wlin.T + blin).reshape(1, d)                       # (1, d)

    Wqkv_p = jnp.pad(Wqkv, ((0, pc), (0, 0))).astype(bf16)         # (d_pad, 3E)
    Wof_p = jnp.pad(Wof, ((0, 0), (0, pc))).astype(bf16)           # (E, d_pad)
    bof_p = jnp.pad(bof, ((0, 0), (0, pc))).astype(f32)            # (1, d_pad)
    return Wqkv_p, bqkv.astype(f32), Wof_p, bof_p


def row_att_block(x, prepped, *, num_heads, head_dims):
    """AttBlock forward on a (b, n, l, d) input as a Pallas TPU kernel."""
    b, n, l, d = x.shape
    H, Dh = num_heads, head_dims
    E = H * Dh
    f32, bf16 = jnp.float32, jnp.bfloat16

    Wqkv_p, bqkv, Wof_p, bof_p = prepped
    d_pad = Wqkv_p.shape[0]

    R = b * n * l                       # total rows (sequence positions)
    N = pl.cdiv(R, SUBLANE) * SUBLANE   # pad rows instead of asserting
    x_pad = jnp.pad(x.reshape(R, d).astype(bf16),
                    ((0, N - R), (0, d_pad - d)))          # (N, d_pad)

    # Precomputed constants (numpy → baked at trace time, no per-step VALU):
    #   hmask: head-lane keep mask for the stacked queries / PV fold.
    #   sbias: additive 0 / -1e30 block-diagonal sequence mask (padded phantom
    #          rows fall into their own blocks, so real rows never see them).
    row = np.arange(H * N)
    hmask = (row[:, None] // N == (np.arange(E)[None, :] // Dh)).astype(np.float32)
    q_seq = (row % N) // l
    k_seq = np.arange(N) // l
    sbias = np.where(q_seq[:, None] == k_seq[None, :], 0.0, -1e30).astype(np.float32)

    def full(shape):
        return pl.BlockSpec(shape, lambda i: (0, 0))

    # G = 1: a single grid step — on 1-TC chips (v5e/v6e) more steps are pure
    # pipeline overhead; on v7x a 2-way "parallel" split could be benchmarked
    # but at these shapes it duplicates weight DMAs and halves MXU row fill.
    grid_spec = pltpu.PrefetchScalarGridSpec(
        num_scalar_prefetch=0,
        grid=(1,),
        in_specs=[
            full((N, d_pad)),           # x rows
            full((d_pad, 3 * E)),       # fused QKV weight
            full((1, 3 * E)),           # fused QKV bias
            full((E, d_pad)),           # fused out-proj weight
            full((1, d_pad)),           # fused out-proj bias
            full((H * N, E)),           # head-lane keep mask
            full((H * N, N)),           # sequence bias
        ],
        out_specs=full((N, d_pad)),
    )

    flops = (2 * N * d_pad * 3 * E              # fused QKV projection
             + 2 * (H * N) * E * N              # scores (as executed)
             + 2 * (H * N) * N * E              # PV (as executed)
             + 2 * N * E * d_pad)               # fused out-projection
    bytes_acc = (2 * N * d_pad + 4 * N * d_pad
                 + 2 * (d_pad * 3 * E + E * d_pad) + 4 * (3 * E + d_pad)
                 + 4 * (H * N * E + H * N * N))
    cost = pl.CostEstimate(flops=flops, transcendentals=H * N * N,
                           bytes_accessed=bytes_acc)

    out = pl.pallas_call(
        partial(row_att_kernel, num_heads=H, head_dims=Dh),
        out_shape=jax.ShapeDtypeStruct((N, d_pad), f32),
        grid_spec=grid_spec,
        compiler_params=pltpu.CompilerParams(dimension_semantics=("arbitrary",)),
        cost_estimate=cost,
    )(x_pad, Wqkv_p, bqkv, Wof_p, bof_p, jnp.asarray(hmask), jnp.asarray(sbias))

    return out[:R, :d].reshape(b, n, l, d)


def reference(x, params, *, num_heads, head_dims):
    """Pure-JAX f32 reference (same math as the PyTorch AttBlock forward)."""
    b, n, l, d = x.shape
    (Qw, Kw, Vw, Wq, Wk, Wv, bq, bk, bv, Wo, bo, Wlin, blin) = params
    H, Dh = num_heads, head_dims
    xf = x.reshape(b * n, l, d)
    q0, k0, v0 = xf @ Qw.T, xf @ Kw.T, xf @ Vw.T
    q = q0 @ Wq.T + bq
    k = k0 @ Wk.T + bk
    v = v0 @ Wv.T + bv
    B, L, E = q.shape
    qh = q.reshape(B, L, H, Dh).transpose(0, 2, 1, 3)
    kh = k.reshape(B, L, H, Dh).transpose(0, 2, 1, 3)
    vh = v.reshape(B, L, H, Dh).transpose(0, 2, 1, 3)
    s = jnp.einsum('bhqd,bhkd->bhqk', qh, kh) / math.sqrt(Dh)
    p = jax.nn.softmax(s, axis=-1)
    a = jnp.einsum('bhqk,bhkd->bhqd', p, vh).transpose(0, 2, 1, 3).reshape(B, L, E)
    o = a @ Wo.T + bo
    y = o @ Wlin.T + blin
    return y.reshape(b, n, l, d)


if __name__ == "__main__":
    # Small shapes consistent with the module's forward.
    b, n, l, d = 2, 3, 8, 32          # in_features = out_features = d
    num_heads, head_dims = 4, 8       # E = 32
    E = num_heads * head_dims

    key = jax.random.PRNGKey(0)
    keys = jax.random.split(key, 16)

    def init(k, shape, fan_in):
        return jax.random.normal(k, shape, jnp.float32) / math.sqrt(fan_in)

    # Deterministic synthetic parameters (PyTorch weight layout).
    Qw = init(keys[0], (E, d), d)               # nn.Linear(d, E, bias=False)
    Kw = init(keys[1], (E, d), d)
    Vw = init(keys[2], (E, d), d)
    Wq = init(keys[3], (E, E), E)               # MHA in_proj_weight split
    Wk = init(keys[4], (E, E), E)
    Wv = init(keys[5], (E, E), E)
    bq = init(keys[6], (E,), E)
    bk = init(keys[7], (E,), E)
    bv = init(keys[8], (E,), E)
    Wo = init(keys[9], (E, E), E)               # MHA out_proj
    bo = init(keys[10], (E,), E)
    Wlin = init(keys[11], (d, E), E)            # nn.Linear(E, d)
    blin = init(keys[12], (d,), E)
    params = (Qw, Kw, Vw, Wq, Wk, Wv, bq, bk, bv, Wo, bo, Wlin, blin)

    x = jax.random.normal(keys[13], (b, n, l, d), jnp.float32)

    # One-time parameter prep (fold / pad / cast), reused across calls.
    prepped = jax.block_until_ready(prepare_params(params, d))

    run = jax.jit(partial(row_att_block, num_heads=num_heads, head_dims=head_dims))
    out = jax.block_until_ready(run(x, prepped))
    ref = jax.block_until_ready(
        reference(x, params, num_heads=num_heads, head_dims=head_dims))

    assert out.shape == (b, n, l, d), out.shape
    max_diff = float(jnp.max(jnp.abs(out - ref)))
    # bf16 MXU operands (f32-folded weights) vs. a float32 reference.
    assert jnp.allclose(out, ref, atol=3e-2, rtol=3e-2), f"max abs diff = {max_diff}"

    print("KERNEL_OK")
</pallas_src>

<mosaic_0001>
module attributes {stable_mosaic.version = 11 : i64} {
  func.func @row_att_kernel(%arg0: i32, %arg1: memref<48x128xbf16, #tpu.memory_space<vmem>>, %arg2: memref<128x96xbf16, #tpu.memory_space<vmem>>, %arg3: memref<1x96xf32, #tpu.memory_space<vmem>>, %arg4: memref<32x128xbf16, #tpu.memory_space<vmem>>, %arg5: memref<1x128xf32, #tpu.memory_space<vmem>>, %arg6: memref<192x32xf32, #tpu.memory_space<vmem>>, %arg7: memref<192x48xf32, #tpu.memory_space<vmem>>, %arg8: memref<48x128xf32, #tpu.memory_space<vmem>>) attributes {dimension_semantics = [#tpu.dimension_semantics<arbitrary>], iteration_bounds = array<i64: 1>, scalar_prefetch = 0 : i64, scratch_operands = 0 : i64, tpu.core_type = #tpu.core_type<tc>, window_params = [{pipeline_mode = #tpu.pipeline_mode<synchronous>, transform_indices = @transform_0, window_bounds = array<i64: 48, 128>}, {pipeline_mode = #tpu.pipeline_mode<synchronous>, transform_indices = @transform_1, window_bounds = array<i64: 128, 96>}, {pipeline_mode = #tpu.pipeline_mode<synchronous>, transform_indices = @transform_2, window_bounds = array<i64: 1, 96>}, {pipeline_mode = #tpu.pipeline_mode<synchronous>, transform_indices = @transform_3, window_bounds = array<i64: 32, 128>}, {pipeline_mode = #tpu.pipeline_mode<synchronous>, transform_indices = @transform_4, window_bounds = array<i64: 1, 128>}, {pipeline_mode = #tpu.pipeline_mode<synchronous>, transform_indices = @transform_5, window_bounds = array<i64: 192, 32>}, {pipeline_mode = #tpu.pipeline_mode<synchronous>, transform_indices = @transform_6, window_bounds = array<i64: 192, 48>}, {pipeline_mode = #tpu.pipeline_mode<synchronous>, transform_indices = @transform_7, window_bounds = array<i64: 48, 128>}]} {
    %c0 = arith.constant 0 : index
    %c0_0 = arith.constant 0 : index
    %0 = vector.load %arg1[%c0, %c0_0] : memref<48x128xbf16, #tpu.memory_space<vmem>>, vector<48x128xbf16>
    %c0_1 = arith.constant 0 : index
    %c0_2 = arith.constant 0 : index
    %1 = vector.load %arg2[%c0_1, %c0_2] : memref<128x96xbf16, #tpu.memory_space<vmem>>, vector<128x96xbf16>
    %cst = arith.constant dense<0.000000e+00> : vector<48x96xf32>
    %2 = tpu.matmul %0, %1, %cst {dimension_numbers = #tpu.dot_dimension_numbers<[1], [0], [0], [1], [0, 0, 1, 1], [], []>} : vector<48x128xbf16>, vector<128x96xbf16>, vector<48x96xf32> -> vector<48x96xf32>
    %c0_3 = arith.constant 0 : index
    %c0_4 = arith.constant 0 : index
    %3 = vector.load %arg3[%c0_3, %c0_4] : memref<1x96xf32, #tpu.memory_space<vmem>>, vector<1x96xf32>
    %4 = vector.broadcast %3 : vector<1x96xf32> to vector<48x96xf32>
    %5 = arith.addf %2, %4 : vector<48x96xf32>
    %6 = vector.extract_strided_slice %5 {offsets = [0, 0], sizes = [48, 32], strides = [1, 1]} : vector<48x96xf32> to vector<48x32xf32>
    %7 = vector.extract_strided_slice %5 {offsets = [0, 32], sizes = [48, 32], strides = [1, 1]} : vector<48x96xf32> to vector<48x32xf32>
    %8 = arith.truncf %7 : vector<48x32xf32> to vector<48x32xbf16>
    %9 = vector.extract_strided_slice %5 {offsets = [0, 64], sizes = [48, 32], strides = [1, 1]} : vector<48x96xf32> to vector<48x32xf32>
    %10 = arith.truncf %9 : vector<48x32xf32> to vector<48x32xbf16>
    %c0_5 = arith.constant 0 : index
    %c0_6 = arith.constant 0 : index
    %11 = vector.load %arg6[%c0_5, %c0_6] : memref<192x32xf32, #tpu.memory_space<vmem>>, vector<192x32xf32>
    %12 = tpu.concatenate %6, %6, %6, %6 in 0 : vector<48x32xf32>, vector<48x32xf32>, vector<48x32xf32>, vector<48x32xf32> -> vector<192x32xf32>
    %13 = arith.mulf %12, %11 : vector<192x32xf32>
    %14 = arith.truncf %13 : vector<192x32xf32> to vector<192x32xbf16>
    %cst_7 = arith.constant dense<0.000000e+00> : vector<192x48xf32>
    %15 = tpu.matmul %14, %8, %cst_7 {dimension_numbers = #tpu.dot_dimension_numbers<[1], [1], [0], [0], [0, 0, 1, 0], [], []>} : vector<192x32xbf16>, vector<48x32xbf16>, vector<192x48xf32> -> vector<192x48xf32>
    %cst_8 = arith.constant 0.353553385 : f32
    %16 = vector.broadcast %cst_8 : f32 to vector<192x48xf32>
    %17 = arith.mulf %15, %16 : vector<192x48xf32>
    %c0_9 = arith.constant 0 : index
    %c0_10 = arith.constant 0 : index
    %18 = vector.load %arg7[%c0_9, %c0_10] : memref<192x48xf32, #tpu.memory_space<vmem>>, vector<192x48xf32>
    %19 = arith.addf %17, %18 : vector<192x48xf32>
    %cst_11 = arith.constant dense<0xFF800000> : vector<192xf32>
    %20 = vector.multi_reduction <maximumf>, %19, %cst_11 [1] : vector<192x48xf32> to vector<192xf32>
    %21 = vector.shape_cast %20 : vector<192xf32> to vector<192x1xf32>
    %22 = vector.broadcast %21 : vector<192x1xf32> to vector<192x48xf32>
    %23 = arith.subf %19, %22 : vector<192x48xf32>
    %24 = math.exp %23 : vector<192x48xf32>
    %cst_12 = arith.constant dense<0.000000e+00> : vector<192xf32>
    %25 = vector.multi_reduction <add>, %24, %cst_12 [1] : vector<192x48xf32> to vector<192xf32>
    %26 = vector.shape_cast %25 : vector<192xf32> to vector<192x1xf32>
    %27 = tpu.reciprocal %26 {approx = true} : vector<192x1xf32> -> vector<192x1xf32>
    %28 = vector.broadcast %27 : vector<192x1xf32> to vector<192x48xf32>
    %29 = arith.mulf %24, %28 : vector<192x48xf32>
    %30 = arith.truncf %29 : vector<192x48xf32> to vector<192x48xbf16>
    %cst_13 = arith.constant dense<0.000000e+00> : vector<192x32xf32>
    %31 = tpu.matmul %30, %10, %cst_13 {dimension_numbers = #tpu.dot_dimension_numbers<[1], [0], [0], [1], [0, 0, 1, 1], [], []>} : vector<192x48xbf16>, vector<48x32xbf16>, vector<192x32xf32> -> vector<192x32xf32>
    %32 = arith.mulf %31, %11 : vector<192x32xf32>
    %33 = vector.extract_strided_slice %32 {offsets = [0, 0], sizes = [48, 32], strides = [1, 1]} : vector<192x32xf32> to vector<48x32xf32>
    %34 = vector.extract_strided_slice %32 {offsets = [48, 0], sizes = [48, 32], strides = [1, 1]} : vector<192x32xf32> to vector<48x32xf32>
    %35 = arith.addf %33, %34 : vector<48x32xf32>
    %36 = vector.extract_strided_slice %32 {offsets = [96, 0], sizes = [48, 32], strides = [1, 1]} : vector<192x32xf32> to vector<48x32xf32>
    %37 = arith.addf %35, %36 : vector<48x32xf32>
    %38 = vector.extract_strided_slice %32 {offsets = [144, 0], sizes = [48, 32], strides = [1, 1]} : vector<192x32xf32> to vector<48x32xf32>
    %39 = arith.addf %37, %38 : vector<48x32xf32>
    %40 = arith.truncf %39 : vector<48x32xf32> to vector<48x32xbf16>
    %c0_14 = arith.constant 0 : index
    %c0_15 = arith.constant 0 : index
    %41 = vector.load %arg4[%c0_14, %c0_15] : memref<32x128xbf16, #tpu.memory_space<vmem>>, vector<32x128xbf16>
    %cst_16 = arith.constant dense<0.000000e+00> : vector<48x128xf32>
    %42 = tpu.matmul %40, %41, %cst_16 {dimension_numbers = #tpu.dot_dimension_numbers<[1], [0], [0], [1], [0, 0, 1, 1], [], []>} : vector<48x32xbf16>, vector<32x128xbf16>, vector<48x128xf32> -> vector<48x128xf32>
    %c0_17 = arith.constant 0 : index
    %c0_18 = arith.constant 0 : index
    %43 = vector.load %arg5[%c0_17, %c0_18] : memref<1x128xf32, #tpu.memory_space<vmem>>, vector<1x128xf32>
    %44 = vector.broadcast %43 : vector<1x128xf32> to vector<48x128xf32>
    %45 = arith.addf %42, %44 : vector<48x128xf32>
    %c0_19 = arith.constant 0 : index
    %c0_20 = arith.constant 0 : index
    %46 = vector.load %arg8[%c0_19, %c0_20] : memref<48x128xf32, #tpu.memory_space<vmem>>, vector<48x128xf32>
    tpu.vector_store %arg8[%c0_19, %c0_20], %45 {strides = array<i32>} : memref<48x128xf32, #tpu.memory_space<vmem>>, vector<48x128xf32>,
    return
  }
  func.func @transform_0(%arg0: i32) -> (i32, i32) {
    %c0_i32 = arith.constant 0 : i32
    %c0_i32_0 = arith.constant 0 : i32
    %c0_i32_1 = arith.constant 0 : i32
    return %c0_i32, %c0_i32_0 : i32, i32
  }
  func.func @transform_1(%arg0: i32) -> (i32, i32) {
    %c0_i32 = arith.constant 0 : i32
    %c0_i32_0 = arith.constant 0 : i32
    %c0_i32_1 = arith.constant 0 : i32
    return %c0_i32, %c0_i32_0 : i32, i32
  }
  func.func @transform_2(%arg0: i32) -> (i32, i32) {
    %c0_i32 = arith.constant 0 : i32
    %c0_i32_0 = arith.constant 0 : i32
    %c0_i32_1 = arith.constant 0 : i32
    return %c0_i32, %c0_i32_0 : i32, i32
  }
  func.func @transform_3(%arg0: i32) -> (i32, i32) {
    %c0_i32 = arith.constant 0 : i32
    %c0_i32_0 = arith.constant 0 : i32
    %c0_i32_1 = arith.constant 0 : i32
    return %c0_i32, %c0_i32_0 : i32, i32
  }
  func.func @transform_4(%arg0: i32) -> (i32, i32) {
    %c0_i32 = arith.constant 0 : i32
    %c0_i32_0 = arith.constant 0 : i32
    %c0_i32_1 = arith.constant 0 : i32
    return %c0_i32, %c0_i32_0 : i32, i32
  }
  func.func @transform_5(%arg0: i32) -> (i32, i32) {
    %c0_i32 = arith.constant 0 : i32
    %c0_i32_0 = arith.constant 0 : i32
    %c0_i32_1 = arith.constant 0 : i32
    return %c0_i32, %c0_i32_0 : i32, i32
  }
  func.func @transform_6(%arg0: i32) -> (i32, i32) {
    %c0_i32 = arith.constant 0 : i32
    %c0_i32_0 = arith.constant 0 : i32
    %c0_i32_1 = arith.constant 0 : i32
    return %c0_i32, %c0_i32_0 : i32, i32
  }
  func.func @transform_7(%arg0: i32) -> (i32, i32) {
    %c0_i32 = arith.constant 0 : i32
    %c0_i32_0 = arith.constant 0 : i32
    %c0_i32_1 = arith.constant 0 : i32
    return %c0_i32, %c0_i32_0 : i32, i32
  }
}

</mosaic_0001>

<bundles_post_ra>
// kernel: row_att_block.1
= control target key start
LH: loop header
LB: loop body
LE: loop exit
PB: predicated region body
PF: predicated region fallthrough
CT: control target
= control target key end

     0   :  { %12 = vsyncpa [#allocation3], 0  ;;  %s1736_s0 = inlined_call_operand.vmem [shape: bf16[48,128], index: 0, kind: input, shape index: {}]   ;;  %s1737_s1 = inlined_call_operand.vmem [shape: bf16[128,96], index: 1, kind: input, shape index: {}]   ;;  %s1738_s2 = inlined_call_operand.vmem [shape: f32[1,96], index: 2, kind: input, shape index: {}]   ;;  %s1739_s3 = inlined_call_operand.vmem [shape: bf16[32,128], index: 3, kind: input, shape index: {}]   ;;  %s1740_s4 = inlined_call_operand.vmem [shape: f32[1,128], index: 4, kind: input, shape index: {}]   ;;  %s1741_s5 = inlined_call_operand.hbm [shape: f32[192,32], index: 5, kind: input, shape index: {}]   ;;  %s1742_s6 = inlined_call_operand.vmem [shape: f32[192,48], index: 6, kind: input, shape index: {}]   ;;  %s1743_s7 = inlined_call_operand.hbm [shape: f32[48,128], index: 7, kind: output, shape index: {}]  }
   0x1   :  { %13 = vsyncpa [#allocation4], 0  ;;  %s28_s26 = sshll.u32 %s1741_s5, 4  ;;  %s1211_s27 = smov [#allocation2]   ;;  %s29_s26 = int_to_ptr.hbm [resolvable:$true] %s28_s26 }
   0x2   :  { %s30_s28 = sshll.u32 %s1211_s27, 4  ;;  %s1212_s29 = smov 128   ;;  %s31_s28 = int_to_ptr.vmem [resolvable:$true] %s30_s28 }
   0x3   :  { %s1213_s30 = smov 8  }
   0x4   :  { %36 = dma.hbm_to_vmem [thread:$0]  %s29_s26, 3072, %s31_s28, [#allocation3], %s1212_s29, %s1212_s29, %s1213_s30  }
   0x5   :  { %1207 = dma.done.wait [#allocation3], 3072  }
   0x6   :  { %1208 = vsyncadd [#allocation3], 4294964224  ;;  %v1022_v0 = vld [vmem:[%s1737_s1 + $0x38] sm:$0xff]  ;;  %v1021_v1 = vld [vmem:[%s1737_s1 + $0x30] sm:$0xff]  ;;  %vm232_vm0 = vcmask 261120   ;;  %vm419_vm1 = vcmask 392192  }
   0x7   :  { %136 = vmatpush.bf16.msra.mxu0 %v1022_v0  ;;  %v1020_v2 = vld [vmem:[%s1737_s1 + $0x28] sm:$0xff]  ;;  %v1019_v3 = vld [vmem:[%s1737_s1 + $0x20] sm:$0xff]  ;;  %v1018_v4 = vld [vmem:[%s1737_s1 + $0x18] sm:$0xff]  ;;  %s1215_s21 = smov 64   ;;  %s1216_s11 = smov [#allocation5]  }
   0x8   :  { %v1017_v5 = vld [vmem:[%s1737_s1 + $0x10] sm:$0xff]  ;;  %v1016_v6 = vld [vmem:[%s1737_s1 + $0x8] sm:$0xff]  ;;  %v1015_v7 = vld [vmem:[%s1737_s1] sm:$0xff]  ;;  %s918_s5 = sshll.u32 %s1216_s11, 4  ;;  %s919_s5 = int_to_ptr.vmem [resolvable:$true] %s918_s5 }
   0x9   :  { %v1012_v8 = vld [vmem:[%s1736_s0] sm:$0xff]  ;;  %v1013_v9 = vld [vmem:[%s1736_s0 + $0x8] sm:$0xff]  ;;  %v1014_v10 = vld [vmem:[%s1736_s0 + $0x10] sm:$0xff]  ;;  %s1214_s0 = smov 96  }
   0xa   :  { %v1037_v12 = vld [vmem:[%s1738_s2] ss:$0 sm:$0xff]  ;;  %v181_v15 = vld [vmem:[#allocation2 + $0x90] sm:$0xff]  ;;  %v164_v18 = vld [vmem:[#allocation2 + $0x8] sm:$0xff] }
   0xb   :  { %137 = vmatpush.bf16.msra.mxu0 %v1021_v1  ;;  %v163_v14 = vld [vmem:[#allocation2] sm:$0xff]  ;;  %v169_v16 = vld [vmem:[#allocation2 + $0x30] sm:$0xff]  ;;  %v182_v19 = vld [vmem:[#allocation2 + $0x98] sm:$0xff] }
   0xc   :  { %v170_v20 = vld [vmem:[#allocation2 + $0x38] sm:$0xff]  ;;  %v175_v22 = vld [vmem:[#allocation2 + $0x60] sm:$0xff]  ;;  %v176_v23 = vld [vmem:[#allocation2 + $0x68] sm:$0xff] }
   0xd   :  { %v165_v39 = vld [vmem:[#allocation2 + $0x10] sm:$0xff]  ;;  %v183_v40 = vld [vmem:[#allocation2 + $0xa0] sm:$0xff]  ;;  %v166_v43 = vld [vmem:[#allocation2 + $0x18] sm:$0xff] }
   0xe   :  { %v171_v41 = vld [vmem:[#allocation2 + $0x40] sm:$0xff]  ;;  %v184_v44 = vld [vmem:[#allocation2 + $0xa8] sm:$0xff]  ;;  %v177_v47 = vld [vmem:[#allocation2 + $0x70] sm:$0xff] }
   0xf   :  { %138 = vmatpush.bf16.msra.mxu0 %v1020_v2  ;;  %v172_v45 = vld [vmem:[#allocation2 + $0x48] sm:$0xff]  ;;  %v178_v48 = vld [vmem:[#allocation2 + $0x78] sm:$0xff]  ;;  %v179_v63 = vld [vmem:[#allocation2 + $0x80] sm:$0xff] }
  0x10   :  { %v167_v0 = vld [vmem:[#allocation2 + $0x20] sm:$0xff]  ;;  %v185_v1 = vld [vmem:[#allocation2 + $0xb0] sm:$0xff] }
  0x13   :  { %139 = vmatpush.bf16.msra.mxu0 %v1019_v3  ;;  %v180_v3 = vld [vmem:[#allocation2 + $0x88] sm:$0xff] }
  0x17   :  { %140 = vmatpush.bf16.msra.mxu0 %v1018_v4  ;;  %v168_v4 = vld [vmem:[#allocation2 + $0x28] sm:$0xff] }
  0x1b   :  { %141 = vmatpush.bf16.msra.mxu0 %v1017_v5  ;;  %v186_v5 = vld [vmem:[#allocation2 + $0xb8] sm:$0xff] }
  0x1f   :  { %142 = vmatpush.bf16.msra.mxu0 %v1016_v6 }
  0x23   :  { %143 = vmatpush.bf16.msra.mxu0 %v1015_v7  ;;  %v173_v7 = vld [vmem:[#allocation2 + $0x50] sm:$0xff] }
  0x26   :  { %144 = vmatmul.bf16.vlgmr.msra.gmra.mxu0 %v1012_v8  ;;  %v174_v8 = vld [vmem:[#allocation2 + $0x58] sm:$0xff] }
  0x36   :  { %149 = vmatmul.bf16.gmra.mxu0 %v1013_v9 }
  0x46   :  { %154 = vmatmul.bf16.gmra.mxu0 %v1014_v10 }
  0xa3   :  { %v145_v11 = vpop.f32.mrf.mxu0 }
  0xa4   :  { %v146_v13 = vadd.f32 %v1037_v12, %v145_v11 }
  0xa6   :  { %v1299_v24 = vmul.f32 %v163_v14, %v146_v13  ;;  %v1301_v25 = vmul.f32 %v181_v15, %v146_v13  ;;  %v1303_v26 = vmul.f32 %v169_v16, %v146_v13  ;;  %v1313_v31 = vmul.f32 %v175_v22, %v146_v13 }
  0xab   :  { %v147_v17 = vpop.f32.mrf.mxu0 }
  0xac   :  { %v148_v21 = vadd.f32 %v1037_v12, %v147_v17 }
  0xae   :  { %v1305_v27 = vpack.c.bf16 %v148_v21, %v146_v13  ;;  %v1307_v28 = vmul.f32 %v164_v18, %v148_v21  ;;  %v1309_v29 = vmul.f32 %v182_v19, %v148_v21  ;;  %v1311_v30 = vmul.f32 %v170_v20, %v148_v21 }
  0xaf   :  { %v1315_v32 = vmul.f32 %v176_v23, %v148_v21 }
  0xb0   :  { %226 = vrot.lane.b32.xlu1 %v1305_v27, %s1214_s0  ;;  %v211_v33 = vpack.c.bf16 %v1307_v28, %v1299_v24  ;;  %v220_v34 = vpack.c.bf16 %v1309_v29, %v1301_v25  ;;  %v214_v35 = vpack.c.bf16 %v1311_v30, %v1303_v26 }
  0xb1   :  { %v217_v36 = vpack.c.bf16 %v1315_v32, %v1313_v31  ;;  %v377_v31 = vld [vmem:[%s1742_s6 + $0x30] sm:$0xff] }
  0xb3   :  { %v150_v37 = vpop.f32.mrf.mxu0 }
  0xb4   :  { %v151_v38 = vadd.f32 %v1037_v12, %v150_v37 }
  0xb6   :  { %v189_v49 = vmul.f32 %v165_v39, %v151_v38  ;;  %v207_v50 = vmul.f32 %v183_v40, %v151_v38  ;;  %v195_v53 = vmul.f32 %v171_v41, %v151_v38  ;;  %v201_v55 = vmul.f32 %v177_v47, %v151_v38  ;;  %v379_v47 = vld [vmem:[%s1742_s6 + $0x40] sm:$0xff] }
  0xbb   :  { %v152_v42 = vpop.f32.mrf.mxu0 }
  0xbc   :  { %v153_v46 = vadd.f32 %v1037_v12, %v152_v42 }
  0xbe   :  { %v190_v51 = vmul.f32 %v166_v43, %v153_v46  ;;  %v208_v52 = vmul.f32 %v184_v44, %v153_v46  ;;  %v196_v54 = vmul.f32 %v172_v45, %v153_v46  ;;  %v202_v56 = vmul.f32 %v178_v48, %v153_v46 }
  0xc0   :  { %v212_v57 = vpack.c.bf16 %v190_v51, %v189_v49  ;;  %v221_v58 = vpack.c.bf16 %v208_v52, %v207_v50  ;;  %v215_v59 = vpack.c.bf16 %v196_v54, %v195_v53  ;;  %v218_v60 = vpack.c.bf16 %v202_v56, %v201_v55  ;;  %v380_v52 = vld [vmem:[%s1742_s6 + $0x48] sm:$0xff] }
  0xc3   :  { %v155_v61 = vpop.f32.mrf.mxu0 }
  0xc4   :  { %v156_v62 = vadd.f32 %v1037_v12, %v155_v61 }
  0xc6   :  { %v203_v9 = vmul.f32 %v179_v63, %v156_v62  ;;  %v191_v10 = vmul.f32 %v167_v0, %v156_v62  ;;  %v209_v11 = vmul.f32 %v185_v1, %v156_v62  ;;  %v197_v17 = vmul.f32 %v173_v7, %v156_v62 }
  0xcb   :  { %v157_v2 = vpop.f32.mrf.mxu0 }
  0xcc   :  { %v158_v6 = vadd.f32 %v1037_v12, %v157_v2  ;;  %v1331_v12 = vpack.c.bf16 %v153_v46, %v151_v38  ;;  %v378_v38 = vld [vmem:[%s1742_s6 + $0x38] sm:$0xff] }
  0xce   :  { %v1327_v13 = vpack.c.bf16 %v158_v6, %v156_v62  ;;  %v204_v14 = vmul.f32 %v180_v3, %v158_v6  ;;  %v192_v15 = vmul.f32 %v168_v4, %v158_v6  ;;  %v210_v16 = vmul.f32 %v186_v5, %v158_v6  ;;  %v382_v62 = vld [vmem:[%s1742_s6 + $0x58] sm:$0xff]  ;;  %v383_v3 = vld [vmem:[%s1742_s6 + $0x60] sm:$0xff] }
  0xcf   :  { %v198_v18 = vmul.f32 %v174_v8, %v158_v6  ;;  %v384_v8 = vld [vmem:[%s1742_s6 + $0x68] sm:$0xff] }
  0xd0   :  { %230 = vrot.lane.b32.xlu0 %v1327_v13, %s1214_s0  ;;  %v219_v19 = vpack.c.bf16 %v204_v14, %v203_v9  ;;  %v213_v20 = vpack.c.bf16 %v192_v15, %v191_v10  ;;  %v222_v21 = vpack.c.bf16 %v210_v16, %v209_v11  ;;  %v385_v16 = vld [vmem:[%s1742_s6 + $0x70] sm:$0xff] }
  0xd1   :  { %v216_v22 = vpack.c.bf16 %v198_v18, %v197_v17 }
  0xd8   :  { %228 = vrot.lane.b32.xlu0 %v1331_v12, %s1214_s0 }
 0x122   :  { %v227_v41 = vpop.permute.xlu1 %226 }
 0x123   :  { %v270_v42 = vsel %vm232_vm0, %v227_v41, 0 }
 0x142   :  { %v231_v23 = vpop.permute.xlu0 %230 }
 0x143   :  { %v276_v37 = vsel %vm232_vm0, %v231_v23, 0 }
 0x144   :  { %283 = vmatpush.bf16.xpose.msra.mxu1 %v276_v37  ;;  %1025 = vmatpush.bf16.xpose.msra.mxu3 %v276_v37 }
 0x14a   :  { %v229_v39 = vpop.permute.xlu0 %228 }
 0x14b   :  { %v273_v40 = vsel %vm232_vm0, %v229_v39, 0 }
 0x14c   :  { %284 = vmatpush.bf16.xpose.msra.mxu1 %v273_v40  ;;  %1026 = vmatpush.bf16.xpose.msra.mxu3 %v273_v40 }
 0x154   :  { %285 = vmatpush.bf16.xpose.msra.mxu1 %v270_v42  ;;  %1027 = vmatpush.bf16.xpose.msra.mxu3 %v270_v42 }
 0x15b   :  { %977 = vmatmul.msk.bf16.vlgmr.msra.gmra.mxu1 %vm232_vm0, %v211_v33  ;;  %985 = vmatmul.msk.bf16.vlgmr.msra.gmra.mxu3 %vm232_vm0, %v219_v19 }
 0x16b   :  { %978 = vmatmul.msk.bf16.gmra.mxu1 %vm232_vm0, %v212_v57  ;;  %986 = vmatmul.msk.bf16.gmra.mxu3 %vm232_vm0, %v220_v34  ;;  %v381_v57 = vld [vmem:[%s1742_s6 + $0x50] sm:$0xff] }
 0x17b   :  { %979 = vmatmul.msk.bf16.gmra.mxu1 %vm232_vm0, %v213_v20  ;;  %987 = vmatmul.msk.bf16.gmra.mxu3 %vm232_vm0, %v221_v58 }
 0x18b   :  { %980 = vmatmul.msk.bf16.gmra.mxu1 %vm232_vm0, %v214_v35  ;;  %988 = vmatmul.msk.bf16.gmra.mxu3 %vm232_vm0, %v222_v21 }
 0x19b   :  { %981 = vmatmul.msk.bf16.gmra.mxu1 %vm232_vm0, %v215_v59 }
 0x1ab   :  { %982 = vmatmul.msk.bf16.gmra.mxu1 %vm232_vm0, %v216_v22 }
 0x1bb   :  { %983 = vmatmul.msk.bf16.gmra.mxu1 %vm232_vm0, %v217_v36 }
 0x1cb   :  { %984 = vmatmul.msk.bf16.gmra.mxu1 %vm232_vm0, %v218_v60 }
 0x1d8   :  { %v1362_v24 = vpop.f32.mrf.mxu1 }
 0x1de   :  { %v327_v22 = vpop.f32.mrf.mxu3 }
 0x1e0   :  { %v1364_v25 = vpop.f32.mrf.mxu1 }
 0x1e6   :  { %v1428_v41 = vpop.f32.mrf.mxu3 }
 0x1e8   :  { %v1366_v26 = vpop.f32.mrf.mxu1 }
 0x1f0   :  { %v1368_v28 = vpop.f32.mrf.mxu1 }
 0x1f8   :  { %v1370_v29 = vpop.f32.mrf.mxu1 }
 0x200   :  { %v1372_v30 = vpop.f32.mrf.mxu1 }
 0x208   :  { %v302_v33 = vpop.f32.mrf.mxu1 }
 0x209   :  { %v353_v32 = vmul.f32 0.35355338, %v302_v33 }
 0x20b   :  { %v401_v34 = vadd.f32 %v377_v31, %v353_v32 }
 0x20d   :  { %v438_v35 = vsel %vm419_vm1, %v401_v34, -inf }
 0x20e   :  { %439 = vmax.xlane.f32.xlu1 %v438_v35  ;;  %v1434_v35 = vpop.f32.mrf.mxu3 }
 0x210   :  { %v304_v36 = vpop.f32.mrf.mxu1 }
 0x211   :  { %v354_v43 = vmul.f32 0.35355338, %v304_v36 }
 0x213   :  { %v402_v44 = vadd.f32 %v378_v38, %v354_v43 }
 0x215   :  { %v441_v45 = vsel %vm419_vm1, %v402_v44, -inf }
 0x216   :  { %442 = vmax.xlane.f32.xlu2 %v441_v45 }
 0x218   :  { %v307_v46 = vpop.f32.mrf.mxu1 }
 0x219   :  { %v355_v48 = vmul.f32 0.35355338, %v307_v46 }
 0x21b   :  { %v1385_v49 = vadd.f32 %v379_v47, %v355_v48  ;;  %v334_v47 = vpop.f32.mrf.mxu3 }
 0x21d   :  { %v444_v50 = vsel %vm419_vm1, %v1385_v49, -inf }
 0x21e   :  { %445 = vmax.xlane.f32.xlu2 %v444_v50 }
 0x220   :  { %v309_v51 = vpop.f32.mrf.mxu1 }
 0x221   :  { %v356_v53 = vmul.f32 0.35355338, %v309_v51  ;;  %v366_v51 = vmul.f32 0.35355338, %v334_v47 }
 0x223   :  { %v404_v54 = vadd.f32 %v380_v52, %v356_v53  ;;  %v390_v53 = vld [vmem:[%s1742_s6 + $0x98] sm:$0xff] }
 0x225   :  { %v447_v55 = vsel %vm419_vm1, %v404_v54, -inf }
 0x226   :  { %448 = vmax.xlane.f32.xlu0 %v447_v55 }
 0x228   :  { %v312_v56 = vpop.f32.mrf.mxu1 }
 0x229   :  { %v357_v58 = vmul.f32 0.35355338, %v312_v56 }
 0x22b   :  { %v405_v59 = vadd.f32 %v381_v57, %v357_v58 }
 0x22d   :  { %v450_v60 = vsel %vm419_vm1, %v405_v59, -inf }
 0x22e   :  { %451 = vmax.xlane.f32.xlu2 %v450_v60 }
 0x230   :  { %v314_v61 = vpop.f32.mrf.mxu1 }
 0x231   :  { %v358_v63 = vmul.f32 0.35355338, %v314_v61 }
 0x233   :  { %v1400_v0 = vadd.f32 %v382_v62, %v358_v63 }
 0x235   :  { %v453_v1 = vsel %vm419_vm1, %v1400_v0, -inf }
 0x236   :  { %454 = vmax.xlane.f32.xlu2 %v453_v1 }
 0x238   :  { %v317_v2 = vpop.f32.mrf.mxu1 }
 0x239   :  { %v359_v4 = vmul.f32 0.35355338, %v317_v2 }
 0x23a   :  { %698 = vrot.lane.b32.xlu0 %v1331_v12, %s1215_s21 }
 0x23b   :  { %v407_v5 = vadd.f32 %v383_v3, %v359_v4  ;;  %v386_v4 = vld [vmem:[%s1742_s6 + $0x78] sm:$0xff] }
 0x23d   :  { %v456_v6 = vsel %vm419_vm1, %v407_v5, -inf }
 0x23e   :  { %457 = vmax.xlane.f32.xlu2 %v456_v6 }
 0x240   :  { %v319_v7 = vpop.f32.mrf.mxu1 }
 0x241   :  { %v360_v9 = vmul.f32 0.35355338, %v319_v7 }
 0x243   :  { %v1413_v10 = vadd.f32 %v384_v8, %v360_v9  ;;  %v363_v9 = vmul.f32 0.35355338, %v327_v22 }
 0x245   :  { %v459_v11 = vsel %vm419_vm1, %v1413_v10, -inf }
 0x246   :  { %460 = vmax.xlane.f32.xlu2 %v459_v11 }
 0x248   :  { %v322_v14 = vpop.f32.mrf.mxu1 }
 0x249   :  { %v361_v15 = vmul.f32 0.35355338, %v322_v14 }
 0x24b   :  { %v1420_v17 = vadd.f32 %v385_v16, %v361_v15  ;;  %v387_v15 = vld [vmem:[%s1742_s6 + $0x80] sm:$0xff] }
 0x24d   :  { %v462_v18 = vsel %vm419_vm1, %v1420_v17, -inf }
 0x250   :  { %v324_v1 = vpop.f32.mrf.mxu1 }
 0x251   :  { %v362_v3 = vmul.f32 0.35355338, %v324_v1 }
 0x253   :  { %v1472_v6 = vadd.f32 %v386_v4, %v362_v3  ;;  %v391_v3 = vld [vmem:[%s1742_s6 + $0xa0] sm:$0xff] }
 0x255   :  { %v465_v11 = vsel %vm419_vm1, %v1472_v6, -inf }
 0x264   :  { %463 = vmax.xlane.f32.xlu0 %v462_v18  ;;  %v1482_v18 = vadd.f32 %v387_v15, %v363_v9 }
 0x281   :  { %v440_v19 = vpop.xlane.xlu1 %439 }
 0x282   :  { %v498_v20 = vsub.f32 %v401_v34, %v440_v19 }
 0x284   :  { %v528_v21 = vmul.f32 1.442695, %v498_v20 }
 0x286   :  { %1039 = vpow2.f32 %v528_v21  ;;  %v364_v21 = vmul.f32 0.35355338, %v1428_v41  ;;  %v347_v41 = vmul.f32 0.35355338, %v1362_v24  ;;  %v389_v24 = vld [vmem:[%s1742_s6 + $0x90] sm:$0xff] }
 0x289   :  { %v443_v12 = vpop.xlane.xlu2 %442 }
 0x28a   :  { %v499_v23 = vsub.f32 %v402_v44, %v443_v12 }
 0x28c   :  { %v1424_v37 = vpop.eup %1039  ;;  %v530_v39 = vmul.f32 1.442695, %v499_v23  ;;  %v388_v23 = vld [vmem:[%s1742_s6 + $0x88] sm:$0xff] }
 0x28d   :  { %v582_v40 = vsel %vm419_vm1, %v1424_v37, 0.0 }
 0x28e   :  { %1041 = vpow2.f32 %v530_v39  ;;  %583 = vadd.xlane.f32.xlu2 %v582_v40 }
 0x291   :  { %v446_v31 = vpop.xlane.xlu2 %445 }
 0x294   :  { %v1430_v42 = vpop.eup %1041 }
 0x295   :  { %v585_v33 = vsel %vm419_vm1, %v1430_v42, 0.0 }
 0x296   :  { %586 = vadd.xlane.f32.xlu1 %v585_v33 }
 0x299   :  { %v449_v32 = vpop.xlane.xlu0 %448 }
 0x29a   :  { %v501_v34 = vsub.f32 %v404_v54, %v449_v32  ;;  %v1451_v54 = vpop.f32.mrf.mxu3 }
 0x29b   :  { %v367_v1 = vmul.f32 0.35355338, %v1451_v54 }
 0x29c   :  { %v534_v36 = vmul.f32 1.442695, %v501_v34  ;;  %v371_v34 = vld [vmem:[%s1742_s6] sm:$0xff] }
 0x29e   :  { %1043 = vpow2.f32 %v534_v36  ;;  %v365_v36 = vmul.f32 0.35355338, %v1434_v35 }
 0x2a0   :  { %v1518_v35 = vadd.f32 %v389_v24, %v365_v36 }
 0x2a1   :  { %v452_v38 = vpop.xlane.xlu2 %451 }
 0x2a2   :  { %v502_v43 = vsub.f32 %v405_v59, %v452_v38  ;;  %v339_v59 = vpop.f32.mrf.mxu3 }
 0x2a3   :  { %v368_v61 = vmul.f32 0.35355338, %v339_v59 }
 0x2a4   :  { %v1436_v44 = vpop.eup %1043  ;;  %v536_v45 = vmul.f32 1.442695, %v502_v43 }
 0x2a5   :  { %v591_v46 = vsel %vm419_vm1, %v1436_v44, 0.0 }
 0x2a6   :  { %1045 = vpow2.f32 %v536_v45  ;;  %700 = vrot.lane.b32.xlu2 %v1327_v13, %s1215_s21  ;;  %592 = vadd.xlane.f32.xlu0 %v591_v46  ;;  %v1453_v13 = vadd.f32 %v390_v53, %v366_v51  ;;  %v1514_v46 = vadd.f32 %v371_v34, %v347_v41  ;;  %v394_v51 = vld [vmem:[%s1742_s6 + $0xb8] sm:$0xff] }
 0x2a8   :  { %v477_v58 = vsel %vm419_vm1, %v1453_v13, -inf }
 0x2a9   :  { %v455_v48 = vpop.xlane.xlu2 %454 }
 0x2aa   :  { %v503_v8 = vsub.f32 %v1400_v0, %v455_v48  ;;  %v342_v19 = vpop.f32.mrf.mxu3  ;;  %v468_v0 = vsel %vm419_vm1, %v1482_v18, -inf }
 0x2ac   :  { %v1442_v50 = vpop.eup %1045  ;;  %v1477_v14 = vpop.permute.xlu0 %698  ;;  %v538_v16 = vmul.f32 1.442695, %v503_v8  ;;  %v374_v8 = vld [vmem:[%s1742_s6 + $0x18] sm:$0xff] }
 0x2ad   :  { %v594_v52 = vsel %vm419_vm1, %v1442_v50, 0.0 }
 0x2ae   :  { %595 = vadd.xlane.f32.xlu0 %v594_v52  ;;  %v420_v52 = vsel %vm419_vm1, %v1514_v46, -inf }
 0x2af   :  { %696 = vrot.lane.b32.xlu1 %v1305_v27, %s1215_s21  ;;  %v392_v27 = vld [vmem:[%s1742_s6 + $0xa8] sm:$0xff] }
 0x2b0   :  { %v1464_v63 = vadd.f32 %v392_v27, %v368_v61  ;;  %v373_v27 = vld [vmem:[%s1742_s6 + $0x10] sm:$0xff] }
 0x2b1   :  { %v458_v55 = vpop.xlane.xlu2 %457 }
 0x2b2   :  { %v504_v56 = vsub.f32 %v407_v5, %v458_v55  ;;  %v483_v2 = vsel %vm419_vm1, %v1464_v63, -inf  ;;  %v500_v5 = vsub.f32 %v1385_v49, %v446_v31  ;;  %v1497_v31 = vadd.f32 %v388_v23, %v364_v21  ;;  %v344_v38 = vpop.f32.mrf.mxu3 }
 0x2b3   :  { %v370_v47 = vmul.f32 0.35355338, %v344_v38  ;;  %v348_v55 = vmul.f32 0.35355338, %v1364_v25 }
 0x2b4   :  { %v540_v57 = vmul.f32 1.442695, %v504_v56  ;;  %v532_v7 = vmul.f32 1.442695, %v500_v5  ;;  %v471_v43 = vsel %vm419_vm1, %v1497_v31, -inf  ;;  %v474_v56 = vsel %vm419_vm1, %v1518_v35, -inf }
 0x2b5   :  { %v1525_v53 = vadd.f32 %v394_v51, %v370_v47 }
 0x2b6   :  { %1047 = vpow2.f32 %v540_v57  ;;  %478 = vmax.xlane.f32.xlu0 %v477_v58  ;;  %v372_v57 = vld [vmem:[%s1742_s6 + $0x8] sm:$0xff] }
 0x2b7   :  { %1049 = vpow2.f32 %v532_v7  ;;  %v489_v59 = vsel %vm419_vm1, %v1525_v53, -inf  ;;  %v1537_v61 = vadd.f32 %v372_v57, %v348_v55  ;;  %v350_v7 = vmul.f32 0.35355338, %v1368_v28  ;;  %v393_v28 = vld [vmem:[%s1742_s6 + $0xb0] sm:$0xff] }
 0x2b8   :  { %1051 = vpow2.f32 %v538_v16  ;;  %v351_v55 = vmul.f32 0.35355338, %v1370_v29 }
 0x2b9   :  { %v461_v39 = vpop.xlane.xlu2 %460  ;;  %v1563_v9 = vadd.f32 %v374_v8, %v350_v7 }
 0x2ba   :  { %v505_v32 = vsub.f32 %v1413_v10, %v461_v39 }
 0x2bb   :  { %v429_v15 = vsel %vm419_vm1, %v1563_v9, -inf }
 0x2bc   :  { %v1457_v60 = vpop.eup %1047  ;;  %v542_v45 = vmul.f32 1.442695, %v505_v32 }
 0x2bd   :  { %v600_v62 = vsel %vm419_vm1, %v1457_v60, 0.0  ;;  %v1484_v49 = vpop.eup %1049 }
 0x2be   :  { %601 = vadd.xlane.f32.xlu0 %v600_v62  ;;  %v588_v12 = vsel %vm419_vm1, %v1484_v49, 0.0  ;;  %v1495_v33 = vpop.eup %1051  ;;  %v349_v62 = vmul.f32 0.35355338, %v1366_v26  ;;  %v1553_v26 = vadd.f32 %v391_v3, %v367_v1 }
 0x2c0   :  { %v1551_v4 = vadd.f32 %v373_v27, %v349_v62  ;;  %v480_v54 = vsel %vm419_vm1, %v1553_v26, -inf }
 0x2c2   :  { %v426_v5 = vsel %vm419_vm1, %v1551_v4, -inf }
 0x2c6   :  { %484 = vmax.xlane.f32.xlu0 %v483_v2  ;;  %v423_v2 = vsel %vm419_vm1, %v1537_v61, -inf }
 0x2cf   :  { %466 = vmax.xlane.f32.xlu2 %v465_v11  ;;  %v369_v11 = vmul.f32 0.35355338, %v342_v19  ;;  %v376_v19 = vld [vmem:[%s1742_s6 + $0x28] sm:$0xff] }
 0x2d7   :  { %v464_v20 = vpop.xlane.xlu0 %463  ;;  %469 = vmax.xlane.f32.xlu2 %v468_v0  ;;  %v1570_v0 = vadd.f32 %v393_v28, %v369_v11 }
 0x2d8   :  { %v506_v22 = vsub.f32 %v1420_v17, %v464_v20  ;;  %v597_v17 = vsel %vm419_vm1, %v1495_v33, 0.0  ;;  %v352_v20 = vmul.f32 0.35355338, %v1372_v30 }
 0x2d9   :  { %589 = vadd.xlane.f32.xlu1 %v588_v12  ;;  %v486_v21 = vsel %vm419_vm1, %v1570_v0, -inf }
 0x2da   :  { %v544_v40 = vmul.f32 1.442695, %v506_v22  ;;  %v1578_v12 = vadd.f32 %v376_v19, %v352_v20 }
 0x2dc   :  { %1053 = vpow2.f32 %v544_v40  ;;  %v435_v30 = vsel %vm419_vm1, %v1578_v12, -inf }
 0x2dd   :  { %1055 = vpow2.f32 %v542_v45 }
 0x2df   :  { %598 = vadd.xlane.f32.xlu2 %v597_v17 }
 0x2e1   :  { %472 = vmax.xlane.f32.xlu1 %v471_v43 }
 0x2e2   :  { %v1512_v10 = vpop.eup %1053 }
 0x2e3   :  { %v606_v48 = vsel %vm419_vm1, %v1512_v10, 0.0  ;;  %v1533_v58 = vpop.eup %1055 }
 0x2e4   :  { %607 = vadd.xlane.f32.xlu0 %v606_v48  ;;  %v603_v25 = vsel %vm419_vm1, %v1533_v58, 0.0 }
 0x2e7   :  { %421 = vmax.xlane.f32.xlu2 %v420_v52 }
 0x2e9   :  { %475 = vmax.xlane.f32.xlu1 %v474_v56 }
 0x2ec   :  { %490 = vmax.xlane.f32.xlu0 %v489_v59 }
 0x2ef   :  { %604 = vadd.xlane.f32.xlu2 %v603_v25 }
 0x2f1   :  { %424 = vmax.xlane.f32.xlu1 %v423_v2 }
 0x2f7   :  { %427 = vmax.xlane.f32.xlu2 %v426_v5 }
 0x2f9   :  { %481 = vmax.xlane.f32.xlu1 %v480_v54 }
 0x301   :  { %430 = vmax.xlane.f32.xlu1 %v429_v15  ;;  %v584_v16 = vpop.xlane.xlu2 %583 }
 0x309   :  { %487 = vmax.xlane.f32.xlu1 %v486_v21  ;;  %v701_v22 = vpop.permute.xlu2 %700  ;;  %v587_v23 = vpop.xlane.xlu1 %586 }
 0x30a   :  { %746 = vmatpush.bf16.msrb.mxu0 %v701_v22  ;;  %1028 = vmatpush.bf16.msra.mxu2 %v701_v22  ;;  %1057 = vrcp.f32 %v587_v23 }
 0x30b   :  { %1059 = vrcp.f32 %v584_v16 }
 0x30e   :  { %747 = vmatpush.bf16.msrb.mxu0 %v1477_v14  ;;  %1029 = vmatpush.bf16.msra.mxu2 %v1477_v14 }
 0x310   :  { %v1058_v39 = vpop.eup %1057 }
 0x311   :  { %436 = vmax.xlane.f32.xlu1 %v435_v30  ;;  %v1060_v40 = vpop.eup %1059  ;;  %v667_v32 = vmul.f32 %v1058_v39, %v1430_v42 }
 0x312   :  { %v666_v17 = vmul.f32 %v1060_v40, %v1424_v37 }
 0x314   :  { %v687_v34 = vpack.c.bf16 %v667_v32, %v666_v17 }
 0x319   :  { %v593_v14 = vpop.xlane.xlu0 %592 }
 0x321   :  { %v697_v41 = vpop.permute.xlu1 %696  ;;  %v596_v36 = vpop.xlane.xlu0 %595 }
 0x322   :  { %748 = vmatpush.bf16.msrb.mxu0 %v697_v41  ;;  %1030 = vmatpush.bf16.msra.mxu2 %v697_v41 }
 0x325   :  { %992 = vmatmul.msk.bf16.vlgmr.msra.gmra.mxu2 %vm419_vm1, %v687_v34 }
 0x329   :  { %v479_v24 = vpop.xlane.xlu0 %478 }
 0x32a   :  { %v511_v37 = vsub.f32 %v1453_v13, %v479_v24 }
 0x32c   :  { %v554_v59 = vmul.f32 1.442695, %v511_v37 }
 0x331   :  { %v602_v57 = vpop.xlane.xlu0 %601 }
 0x342   :  { %v467_v38 = vpop.xlane.xlu2 %466 }
 0x343   :  { %v507_v43 = vsub.f32 %v1472_v6, %v467_v38  ;;  %v375_v6 = vld [vmem:[%s1742_s6 + $0x20] sm:$0xff] }
 0x344   :  { %v1598_v25 = vadd.f32 %v375_v6, %v351_v55 }
 0x345   :  { %v546_v45 = vmul.f32 1.442695, %v507_v43 }
 0x346   :  { %v432_v5 = vsel %vm419_vm1, %v1598_v25, -inf }
 0x347   :  { %1061 = vpow2.f32 %v546_v45 }
 0x348   :  { %1063 = vrcp.f32 %v593_v14 }
 0x34a   :  { %v470_v47 = vpop.xlane.xlu2 %469 }
 0x34b   :  { %v508_v42 = vsub.f32 %v1482_v18, %v470_v47 }
 0x34c   :  { %v590_v48 = vpop.xlane.xlu1 %589 }
 0x34d   :  { %v1589_v51 = vpop.eup %1061  ;;  %v548_v52 = vmul.f32 1.442695, %v508_v42  ;;  %1065 = vrcp.f32 %v590_v48 }
 0x34e   :  { %v609_v56 = vsel %vm419_vm1, %v1589_v51, 0.0  ;;  %v1064_v18 = vpop.eup %1063 }
 0x34f   :  { %1067 = vpow2.f32 %v548_v52  ;;  %610 = vadd.xlane.f32.xlu2 %v609_v56  ;;  %v669_v29 = vmul.f32 %v1064_v18, %v1436_v44  ;;  %v485_v44 = vpop.xlane.xlu0 %484 }
 0x350   :  { %1069 = vpow2.f32 %v554_v59  ;;  %v513_v19 = vsub.f32 %v1464_v63, %v485_v44 }
 0x352   :  { %v599_v62 = vpop.xlane.xlu2 %598  ;;  %v558_v32 = vmul.f32 1.442695, %v513_v19 }
 0x353   :  { %v1066_v13 = vpop.eup %1065  ;;  %1071 = vrcp.f32 %v599_v62 }
 0x354   :  { %v473_v27 = vpop.xlane.xlu1 %472  ;;  %v668_v1 = vmul.f32 %v1066_v13, %v1484_v49 }
 0x355   :  { %v1602_v2 = vpop.eup %1067  ;;  %v509_v3 = vsub.f32 %v1497_v31, %v473_v27 }
 0x356   :  { %v612_v7 = vsel %vm419_vm1, %v1602_v2, 0.0  ;;  %v688_v54 = vpack.c.bf16 %v669_v29, %v668_v1  ;;  %v1610_v11 = vpop.eup %1069 }
 0x357   :  { %v550_v8 = vmul.f32 1.442695, %v509_v3  ;;  %433 = vmax.xlane.f32.xlu2 %v432_v5  ;;  %613 = vadd.xlane.f32.xlu0 %v612_v7  ;;  %v621_v21 = vsel %vm419_vm1, %v1610_v11, 0.0 }
 0x358   :  { %993 = vmatmul.msk.bf16.gmra.mxu2 %vm419_vm1, %v688_v54 }
 0x359   :  { %1073 = vpow2.f32 %v550_v8  ;;  %v1072_v20 = vpop.eup %1071 }
 0x35a   :  { %v422_v49 = vpop.xlane.xlu2 %421  ;;  %1075 = vrcp.f32 %v596_v36  ;;  %v671_v40 = vmul.f32 %v1072_v20, %v1495_v33 }
 0x35b   :  { %v492_v31 = vsub.f32 %v1514_v46, %v422_v49  ;;  %v1621_v46 = vpop.xlane.xlu0 %607 }
 0x35c   :  { %v476_v15 = vpop.xlane.xlu1 %475 }
 0x35d   :  { %v516_v16 = vmul.f32 1.442695, %v492_v31  ;;  %v510_v28 = vsub.f32 %v1518_v35, %v476_v15 }
 0x35f   :  { %v1616_v22 = vpop.eup %1073  ;;  %1077 = vpow2.f32 %v516_v16  ;;  %v552_v30 = vmul.f32 1.442695, %v510_v28  ;;  %622 = vadd.xlane.f32.xlu0 %v621_v21 }
 0x360   :  { %v615_v23 = vsel %vm419_vm1, %v1616_v22, 0.0  ;;  %v1076_v39 = vpop.eup %1075 }
 0x361   :  { %1079 = vpow2.f32 %v552_v30  ;;  %616 = vadd.xlane.f32.xlu2 %v615_v23  ;;  %v670_v17 = vmul.f32 %v1076_v39, %v1442_v50 }
 0x362   :  { %v605_v35 = vpop.xlane.xlu2 %604  ;;  %1081 = vpow2.f32 %v558_v32 }
 0x363   :  { %v689_v14 = vpack.c.bf16 %v671_v40, %v670_v17  ;;  %1083 = vrcp.f32 %v605_v35  ;;  %v491_v45 = vpop.xlane.xlu0 %490 }
 0x364   :  { %v425_v41 = vpop.xlane.xlu1 %424  ;;  %v515_v55 = vsub.f32 %v1525_v53, %v491_v45 }
 0x365   :  { %v1625_v34 = vpop.eup %1077  ;;  %v493_v63 = vsub.f32 %v1537_v61, %v425_v41 }
 0x366   :  { %v564_v33 = vsel %vm419_vm1, %v1625_v34, 0.0 }
 0x367   :  { %v1628_v36 = vpop.eup %1079  ;;  %v518_v38 = vmul.f32 1.442695, %v493_v63 }
 0x368   :  { %994 = vmatmul.msk.bf16.gmra.mxu2 %vm419_vm1, %v689_v14  ;;  %v618_v43 = vsel %vm419_vm1, %v1628_v36, 0.0  ;;  %v1636_v47 = vpop.eup %1081 }
 0x369   :  { %1085 = vpow2.f32 %v518_v38  ;;  %619 = vadd.xlane.f32.xlu1 %v618_v43  ;;  %565 = vadd.xlane.f32.xlu2 %v564_v33  ;;  %v1084_v37 = vpop.eup %1083 }
 0x36a   :  { %v428_v50 = vpop.xlane.xlu2 %427  ;;  %1087 = vrcp.f32 %v602_v57  ;;  %v673_v18 = vmul.f32 %v1084_v37, %v1533_v58 }
 0x36b   :  { %v494_v61 = vsub.f32 %v1551_v4, %v428_v50  ;;  %v627_v4 = vsel %vm419_vm1, %v1636_v47, 0.0 }
 0x36c   :  { %v482_v24 = vpop.xlane.xlu1 %481 }
 0x36d   :  { %v520_v42 = vmul.f32 1.442695, %v494_v61  ;;  %v512_v48 = vsub.f32 %v1553_v26, %v482_v24  ;;  %v562_v26 = vmul.f32 1.442695, %v515_v55 }
 0x36f   :  { %v1639_v52 = vpop.eup %1085  ;;  %1089 = vpow2.f32 %v520_v42  ;;  %v556_v56 = vmul.f32 1.442695, %v512_v48 }
 0x370   :  { %v567_v6 = vsel %vm419_vm1, %v1639_v52, 0.0  ;;  %v1088_v57 = vpop.eup %1087 }
 0x371   :  { %1091 = vpow2.f32 %v556_v56  ;;  %568 = vadd.xlane.f32.xlu1 %v567_v6  ;;  %628 = vadd.xlane.f32.xlu2 %v627_v4  ;;  %v672_v62 = vmul.f32 %v1088_v57, %v1457_v60 }
 0x372   :  { %1093 = vpow2.f32 %v562_v26 }
 0x373   :  { %v690_v27 = vpack.c.bf16 %v673_v18, %v672_v62 }
 0x374   :  { %v431_v59 = vpop.xlane.xlu1 %430 }
 0x375   :  { %v1648_v13 = vpop.eup %1089  ;;  %v495_v53 = vsub.f32 %v1563_v9, %v431_v59 }
 0x376   :  { %v570_v58 = vsel %vm419_vm1, %v1648_v13, 0.0 }
 0x377   :  { %v1651_v1 = vpop.eup %1091  ;;  %v522_v29 = vmul.f32 1.442695, %v495_v53 }
 0x378   :  { %995 = vmatmul.msk.bf16.gmra.mxu2 %vm419_vm1, %v690_v27  ;;  %v624_v3 = vsel %vm419_vm1, %v1651_v1, 0.0  ;;  %v1658_v5 = vpop.eup %1093 }
 0x379   :  { %1095 = vpow2.f32 %v522_v29  ;;  %625 = vadd.xlane.f32.xlu0 %v624_v3  ;;  %571 = vadd.xlane.f32.xlu1 %v570_v58  ;;  %v633_v44 = vsel %vm419_vm1, %v1658_v5, 0.0 }
 0x37c   :  { %v488_v60 = vpop.xlane.xlu1 %487 }
 0x37d   :  { %v514_v9 = vsub.f32 %v1570_v0, %v488_v60 }
 0x37f   :  { %v1661_v7 = vpop.eup %1095  ;;  %v560_v54 = vmul.f32 1.442695, %v514_v9 }
 0x380   :  { %v573_v8 = vsel %vm419_vm1, %v1661_v7, 0.0 }
 0x381   :  { %1097 = vpow2.f32 %v560_v54  ;;  %574 = vadd.xlane.f32.xlu0 %v573_v8  ;;  %634 = vadd.xlane.f32.xlu1 %v633_v44 }
 0x384   :  { %v437_v49 = vpop.xlane.xlu1 %436 }
 0x385   :  { %v497_v31 = vsub.f32 %v1578_v12, %v437_v49 }
 0x387   :  { %v1668_v15 = vpop.eup %1097  ;;  %v526_v16 = vmul.f32 1.442695, %v497_v31 }
 0x388   :  { %v630_v0 = vsel %vm419_vm1, %v1668_v15, 0.0 }
 0x389   :  { %1099 = vpow2.f32 %v526_v16  ;;  %631 = vadd.xlane.f32.xlu2 %v630_v0 }
 0x38a   :  { %1101 = vrcp.f32 %v1621_v46 }
 0x38f   :  { %v1672_v28 = vpop.eup %1099 }
 0x390   :  { %v579_v20 = vsel %vm419_vm1, %v1672_v28, 0.0  ;;  %v1102_v19 = vpop.eup %1101 }
 0x391   :  { %580 = vadd.xlane.f32.xlu2 %v579_v20  ;;  %v674_v23 = vmul.f32 %v1102_v19, %v1512_v10 }
 0x3a8   :  { %v765_v9 = vpop.f32.mrf.mxu2 }
 0x3b0   :  { %v767_v44 = vpop.f32.mrf.mxu2 }
 0x3c2   :  { %v611_v21 = vpop.xlane.xlu2 %610 }
 0x3c3   :  { %1103 = vrcp.f32 %v611_v21 }
 0x3c9   :  { %v1104_v12 = vpop.eup %1103 }
 0x3ca   :  { %v434_v30 = vpop.xlane.xlu2 %433  ;;  %v675_v39 = vmul.f32 %v1104_v12, %v1589_v51  ;;  %v614_v41 = vpop.xlane.xlu0 %613 }
 0x3cb   :  { %v496_v35 = vsub.f32 %v1598_v25, %v434_v30 }
 0x3cc   :  { %v691_v40 = vpack.c.bf16 %v675_v39, %v674_v23 }
 0x3cd   :  { %v524_v32 = vmul.f32 1.442695, %v496_v35  ;;  %v1024_v35 = vld [vmem:[%s1739_s3 + $0x8] sm:$0xff] }
 0x3ce   :  { %996 = vmatmul.msk.bf16.gmra.mxu2 %vm419_vm1, %v691_v40  ;;  %890 = vmatpush.bf16.msrb.mxu3 %v1024_v35  ;;  %v1151_v35 = vld [vmem:[#allocation2 + $0x50] sm:$0xff] }
 0x3cf   :  { %1105 = vpow2.f32 %v524_v32  ;;  %v1023_v32 = vld [vmem:[%s1739_s3] sm:$0xff] }
 0x3d0   :  { %1107 = vrcp.f32 %v614_v41 }
 0x3d2   :  { %v623_v33 = vpop.xlane.xlu0 %622  ;;  %891 = vmatpush.bf16.msrb.mxu3 %v1023_v32 }
 0x3d4   :  { %v617_v17 = vpop.xlane.xlu2 %616 }
 0x3d5   :  { %v1681_v46 = vpop.eup %1105  ;;  %1109 = vrcp.f32 %v617_v17 }
 0x3d6   :  { %v576_v63 = vsel %vm419_vm1, %v1681_v46, 0.0  ;;  %v1108_v10 = vpop.eup %1107 }
 0x3d7   :  { %577 = vadd.xlane.f32.xlu0 %v576_v63  ;;  %v676_v25 = vmul.f32 %v1108_v10, %v1602_v2  ;;  %v1135_v63 = vld [vmem:[#allocation2] sm:$0xff] }
 0x3db   :  { %v1110_v14 = vpop.eup %1109 }
 0x3dc   :  { %v620_v51 = vpop.xlane.xlu1 %619  ;;  %v677_v38 = vmul.f32 %v1110_v14, %v1616_v22  ;;  %v566_v50 = vpop.xlane.xlu2 %565 }
 0x3dd   :  { %1111 = vrcp.f32 %v620_v51  ;;  %v1136_v51 = vld [vmem:[#allocation2 + $0x30] sm:$0xff] }
 0x3de   :  { %v692_v43 = vpack.c.bf16 %v677_v38, %v676_v25  ;;  %1113 = vrcp.f32 %v623_v33  ;;  %v816_v25 = vmul.f32 %v1136_v51, %v765_v9  ;;  %v1137_v38 = vld [vmem:[#allocation2 + $0x38] sm:$0xff]  ;;  %v1138_v33 = vld [vmem:[#allocation2 + $0x8] sm:$0xff] }
 0x3df   :  { %1115 = vrcp.f32 %v566_v50  ;;  %v1154_v51 = vld [vmem:[#allocation2 + $0x58] sm:$0xff] }
 0x3e0   :  { %997 = vmatmul.msk.bf16.gmra.mxu2 %vm419_vm1, %v692_v43  ;;  %v817_v43 = vmul.f32 %v1137_v38, %v767_v44  ;;  %v1149_v44 = vld [vmem:[#allocation2 + $0xa0] sm:$0xff]  ;;  %v1155_v38 = vld [vmem:[#allocation2 + $0x28] sm:$0xff] }
 0x3e3   :  { %v1112_v45 = vpop.eup %1111 }
 0x3e4   :  { %v569_v61 = vpop.xlane.xlu1 %568  ;;  %v1114_v24 = vpop.eup %1113  ;;  %v678_v48 = vmul.f32 %v1112_v45, %v1628_v36 }
 0x3e5   :  { %1117 = vrcp.f32 %v569_v61  ;;  %v1116_v42 = vpop.eup %1115  ;;  %v679_v56 = vmul.f32 %v1114_v24, %v1610_v11  ;;  %v629_v57 = vpop.xlane.xlu2 %628  ;;  %v1139_v24 = vld [vmem:[#allocation2 + $0x60] sm:$0xff] }
 0x3e6   :  { %v660_v2 = vmul.f32 %v1116_v42, %v1625_v34 }
 0x3e7   :  { %v693_v4 = vpack.c.bf16 %v679_v56, %v678_v48  ;;  %v1140_v48 = vld [vmem:[#allocation2 + $0x68] sm:$0xff] }
 0x3eb   :  { %v1118_v37 = vpop.eup %1117 }
 0x3ec   :  { %v661_v22 = vmul.f32 %v1118_v37, %v1639_v52  ;;  %v626_v55 = vpop.xlane.xlu0 %625  ;;  %v572_v18 = vpop.xlane.xlu1 %571 }
 0x3ed   :  { %1119 = vrcp.f32 %v626_v55 }
 0x3ee   :  { %v684_v6 = vpack.c.bf16 %v661_v22, %v660_v2  ;;  %1121 = vrcp.f32 %v629_v57  ;;  %v1141_v2 = vld [vmem:[#allocation2 + $0x90] sm:$0xff] }
 0x3ef   :  { %1123 = vrcp.f32 %v572_v18 }
 0x3f0   :  { %989 = vmatmul.msk.bf16.vlgmr.msrb.gmra.mxu0 %vm419_vm1, %v684_v6  ;;  %998 = vmatmul.msk.bf16.gmra.mxu2 %vm419_vm1, %v693_v4  ;;  %v1142_v6 = vld [vmem:[#allocation2 + $0x98] sm:$0xff] }
 0x3f3   :  { %v1120_v26 = vpop.eup %1119 }
 0x3f4   :  { %v575_v36 = vpop.xlane.xlu0 %574  ;;  %v1122_v34 = vpop.eup %1121  ;;  %v680_v52 = vmul.f32 %v1120_v26, %v1651_v1 }
 0x3f5   :  { %1125 = vrcp.f32 %v575_v36  ;;  %v1124_v59 = vpop.eup %1123  ;;  %v681_v27 = vmul.f32 %v1122_v34, %v1636_v47  ;;  %v635_v60 = vpop.xlane.xlu1 %634 }
 0x3f6   :  { %v662_v11 = vmul.f32 %v1124_v59, %v1648_v13  ;;  %v770_v47 = vpop.f32.mrf.mxu2 }
 0x3f7   :  { %v694_v58 = vpack.c.bf16 %v681_v27, %v680_v52  ;;  %v1143_v52 = vld [vmem:[#allocation2 + $0x10] sm:$0xff] }
 0x3fb   :  { %v1126_v62 = vpop.eup %1125 }
 0x3fc   :  { %v663_v53 = vmul.f32 %v1126_v62, %v1661_v7  ;;  %v632_v29 = vpop.xlane.xlu2 %631 }
 0x3fd   :  { %1127 = vrcp.f32 %v632_v29  ;;  %v1145_v29 = vld [vmem:[#allocation2 + $0x48] sm:$0xff] }
 0x3fe   :  { %v685_v3 = vpack.c.bf16 %v663_v53, %v662_v11  ;;  %1129 = vrcp.f32 %v635_v60  ;;  %v772_v49 = vpop.f32.mrf.mxu2  ;;  %v1144_v53 = vld [vmem:[#allocation2 + $0x40] sm:$0xff] }
 0x3ff   :  { %v818_v27 = vmul.f32 %v1144_v53, %v770_v47 }
 0x400   :  { %990 = vmatmul.msk.bf16.gmra.mxu0 %vm419_vm1, %v685_v3  ;;  %999 = vmatmul.msk.bf16.gmra.mxu2 %vm419_vm1, %v694_v58  ;;  %v819_v3 = vmul.f32 %v1145_v29, %v772_v49  ;;  %v1146_v58 = vld [vmem:[#allocation2 + $0x18] sm:$0xff] }
 0x403   :  { %v1128_v54 = vpop.eup %1127 }
 0x404   :  { %v1130_v1 = vpop.eup %1129  ;;  %v682_v8 = vmul.f32 %v1128_v54, %v1668_v15  ;;  %v581_v20 = vpop.xlane.xlu2 %580 }
 0x405   :  { %v683_v13 = vmul.f32 %v1130_v1, %v1658_v5  ;;  %1131 = vrcp.f32 %v581_v20  ;;  %v1147_v1 = vld [vmem:[#allocation2 + $0x70] sm:$0xff] }
 0x406   :  { %v1703_v31 = vpop.f32.mrf.mxu2 }
 0x407   :  { %v695_v7 = vpack.c.bf16 %v683_v13, %v682_v8  ;;  %v1148_v13 = vld [vmem:[#allocation2 + $0x78] sm:$0xff]  ;;  %v820_v32 = vmul.f32 %v1151_v35, %v1703_v31 }
 0x40b   :  { %v1132_v12 = vpop.eup %1131 }
 0x40c   :  { %v665_v23 = vmul.f32 %v1132_v12, %v1672_v28 }
 0x40e   :  { %v1705_v16 = vpop.f32.mrf.mxu2 }
 0x410   :  { %1000 = vmatmul.msk.bf16.gmra.mxu2 %vm419_vm1, %v695_v7 }
 0x416   :  { %v780_v0 = vpop.f32.mrf.mxu2 }
 0x417   :  { %v822_v42 = vmul.f32 %v1139_v24, %v780_v0  ;;  %v1157_v24 = vld [vmem:[#allocation2 + $0xb0] sm:$0xff] }
 0x41e   :  { %v782_v21 = vpop.f32.mrf.mxu2 }
 0x41f   :  { %v823_v37 = vmul.f32 %v1140_v48, %v782_v21 }
 0x44a   :  { %v578_v19 = vpop.xlane.xlu0 %577 }
 0x44b   :  { %1133 = vrcp.f32 %v578_v19  ;;  %v1150_v19 = vld [vmem:[#allocation2 + $0xa8] sm:$0xff] }
 0x451   :  { %v1134_v15 = vpop.eup %1133  ;;  %v785_v30 = vpop.f32.mrf.mxu2 }
 0x452   :  { %v664_v5 = vmul.f32 %v1134_v15, %v1681_v46  ;;  %v824_v8 = vmul.f32 %v1147_v1, %v785_v30  ;;  %v1152_v30 = vld [vmem:[#allocation2 + $0x20] sm:$0xff] }
 0x454   :  { %v686_v39 = vpack.c.bf16 %v665_v23, %v664_v5 }
 0x456   :  { %991 = vmatmul.msk.bf16.gmra.mxu0 %vm419_vm1, %v686_v39 }
 0x459   :  { %v787_v40 = vpop.f32.mrf.mxu2 }
 0x45a   :  { %v825_v7 = vmul.f32 %v1148_v13, %v787_v40  ;;  %v1153_v40 = vld [vmem:[#allocation2 + $0x80] sm:$0xff] }
 0x463   :  { %v1716_v41 = vpop.f32.mrf.mxu2 }
 0x46b   :  { %v1718_v17 = vpop.f32.mrf.mxu2 }
 0x46d   :  { %v750_v46 = vpop.f32.mrf.mxu0 }
 0x46e   :  { %v810_v10 = vmul.f32 %v1135_v63, %v750_v46 }
 0x470   :  { %v834_v61 = vadd.f32 %v816_v25, %v810_v10  ;;  %v821_v25 = vmul.f32 %v1154_v51, %v1705_v16  ;;  %v1038_v16 = vld [vmem:[%s1740_s4] ss:$0 sm:$0xff]  ;;  %s920_s4 = sshll.u32 %s1743_s7, 4  ;;  %s921_s4 = int_to_ptr.hbm [resolvable:$true] %s920_s4 }
 0x472   :  { %v840_v56 = vadd.f32 %v834_v61, %v822_v42  ;;  %v1158_v42 = vld [vmem:[#allocation2 + $0xb8] sm:$0xff] }
 0x473   :  { %v795_v28 = vpop.f32.mrf.mxu2 }
 0x474   :  { %v828_v22 = vmul.f32 %v1141_v2, %v795_v28  ;;  %v826_v28 = vmul.f32 %v1153_v40, %v1716_v41 }
 0x475   :  { %v752_v14 = vpop.f32.mrf.mxu0 }
 0x476   :  { %v811_v50 = vmul.f32 %v1138_v33, %v752_v14  ;;  %v846_v36 = vadd.f32 %v840_v56, %v828_v22 }
 0x478   :  { %v835_v45 = vadd.f32 %v817_v43, %v811_v50  ;;  %v1156_v50 = vld [vmem:[#allocation2 + $0x88] sm:$0xff] }
 0x479   :  { %v827_v61 = vmul.f32 %v1156_v50, %v1718_v17 }
 0x47a   :  { %v841_v57 = vadd.f32 %v835_v45, %v823_v37 }
 0x47b   :  { %v797_v55 = vpop.f32.mrf.mxu2 }
 0x47c   :  { %v829_v4 = vmul.f32 %v1142_v6, %v797_v55 }
 0x47d   :  { %v755_v18 = vpop.f32.mrf.mxu0 }
 0x47e   :  { %v847_v26 = vadd.f32 %v841_v57, %v829_v4  ;;  %v812_v62 = vmul.f32 %v1143_v52, %v755_v18 }
 0x480   :  { %v852_v34 = vpack.c.bf16 %v847_v26, %v846_v36  ;;  %v836_v9 = vadd.f32 %v818_v27, %v812_v62 }
 0x482   :  { %1009 = vmatmul.msk.bf16.vlgmr.msrb.gmra.mxu3 %vm232_vm0, %v852_v34  ;;  %v842_v21 = vadd.f32 %v836_v9, %v824_v8 }
 0x483   :  { %v800_v59 = vpop.f32.mrf.mxu2 }
 0x484   :  { %v830_v0 = vmul.f32 %v1149_v44, %v800_v59 }
 0x485   :  { %v757_v11 = vpop.f32.mrf.mxu0 }
 0x486   :  { %v813_v60 = vmul.f32 %v1146_v58, %v757_v11  ;;  %v848_v5 = vadd.f32 %v842_v21, %v830_v0 }
 0x488   :  { %v837_v54 = vadd.f32 %v819_v3, %v813_v60 }
 0x48a   :  { %v843_v15 = vadd.f32 %v837_v54, %v825_v7 }
 0x48b   :  { %v802_v20 = vpop.f32.mrf.mxu2 }
 0x48c   :  { %v831_v12 = vmul.f32 %v1150_v19, %v802_v20 }
 0x48e   :  { %v849_v23 = vadd.f32 %v843_v15, %v831_v12 }
 0x490   :  { %v853_v47 = vpack.c.bf16 %v849_v23, %v848_v5 }
 0x492   :  { %1010 = vmatmul.msk.bf16.gmra.mxu3 %vm232_vm0, %v853_v47 }
 0x493   :  { %v805_v49 = vpop.f32.mrf.mxu2 }
 0x494   :  { %v832_v31 = vmul.f32 %v1157_v24, %v805_v49 }
 0x49b   :  { %v807_v33 = vpop.f32.mrf.mxu2 }
 0x49c   :  { %v833_v48 = vmul.f32 %v1158_v42, %v807_v33 }
 0x4d3   :  { %v760_v39 = vpop.f32.mrf.mxu0 }
 0x4d4   :  { %v814_v46 = vmul.f32 %v1152_v30, %v760_v39 }
 0x4d6   :  { %v838_v63 = vadd.f32 %v820_v32, %v814_v46 }
 0x4d8   :  { %v844_v10 = vadd.f32 %v838_v63, %v826_v28 }
 0x4da   :  { %v850_v2 = vadd.f32 %v844_v10, %v832_v31 }
 0x4db   :  { %v762_v14 = vpop.f32.mrf.mxu0 }
 0x4dc   :  { %v815_v43 = vmul.f32 %v1155_v38, %v762_v14 }
 0x4de   :  { %v839_v45 = vadd.f32 %v821_v25, %v815_v43 }
 0x4e0   :  { %v845_v37 = vadd.f32 %v839_v45, %v827_v61 }
 0x4e2   :  { %v851_v41 = vadd.f32 %v845_v37, %v833_v48 }
 0x4e4   :  { %v854_v22 = vpack.c.bf16 %v851_v41, %v850_v2 }
 0x4e6   :  { %1011 = vmatmul.msk.bf16.gmra.mxu3 %vm232_vm0, %v854_v22 }
 0x505   :  { %v893_v55 = vpop.f32.mrf.mxu3 }
 0x506   :  { %v894_v56 = vadd.f32 %v1038_v16, %v893_v55 }
 0x508   :  { %908 = vst [vmem:[#allocation5] sm:$0xff] %v894_v56 }
 0x50d   :  { %v895_v6 = vpop.f32.mrf.mxu3 }
 0x50e   :  { %v896_v17 = vadd.f32 %v1038_v16, %v895_v6 }
 0x510   :  { %909 = vst [vmem:[#allocation5 + $0x8] sm:$0xff] %v896_v17 }
 0x515   :  { %v898_v4 = vpop.f32.mrf.mxu3 }
 0x516   :  { %v899_v57 = vadd.f32 %v1038_v16, %v898_v4 }
 0x518   :  { %910 = vst [vmem:[#allocation5 + $0x10] sm:$0xff] %v899_v57 }
 0x51d   :  { %v900_v18 = vpop.f32.mrf.mxu3 }
 0x51e   :  { %v901_v36 = vadd.f32 %v1038_v16, %v900_v18 }
 0x520   :  { %911 = vst [vmem:[#allocation5 + $0x18] sm:$0xff] %v901_v36 }
 0x569   :  { %v903_v26 = vpop.f32.mrf.mxu3 }
 0x56a   :  { %v904_v34 = vadd.f32 %v1038_v16, %v903_v26 }
 0x56c   :  { %912 = vst [vmem:[#allocation5 + $0x20] sm:$0xff] %v904_v34 }
 0x571   :  { %v905_v59 = vpop.f32.mrf.mxu3 }
 0x572   :  { %v906_v52 = vadd.f32 %v1038_v16, %v905_v59 }
 0x574   :  { %913 = vst [vmem:[#allocation5 + $0x28] sm:$0xff] %v906_v52 }
 0x575   :  { %926 = dma.vmem_to_hbm [thread:$0]  %s919_s5, 768, %s921_s4, [#allocation4], %s1212_s29, %s1212_s29, %s1213_s30  }
 0x576   :  { %1209 = dma.done.wait [#allocation4], 768  }
 0x577   :  { %1210 = vsyncadd [#allocation4], 4294966528 }
 0x578   :  { %931 = vsyncpa [#allocation3], 1 }
 0x579   :  { %932 = vsyncpa [#allocation4], 1 }

</bundles_post_ra>
